<compile_context>
chip_gen: v5e
topology: v5e:2x2
jax: 0.10.0
libtpu: 0.0.40
codegen_flags: <defaults>
</compile_context>

<pallas_src>
import functools

import jax
import jax.numpy as jnp
from jax import lax
from jax.experimental import pallas as pl
from jax.experimental.pallas import tpu as pltpu


def _round_up(x, m):
    return (x + m - 1) // m * m


# --------------------------------------------------------------------------
# Pallas kernels
# --------------------------------------------------------------------------
def _sigmoid(y):
    return 1.0 / (1.0 + jnp.exp(-y))


def _mm_kernel(*refs, nk, has_res, act):
    """out = act((x @ w) + bias [+ residual]); K reduced over the last grid axis."""
    if nk > 1:
        acc_ref = refs[-1]
        refs = refs[:-1]
    else:
        acc_ref = None
    o_ref = refs[-1]
    if has_res:
        x_ref, w_ref, b_ref, r_ref = refs[:-1]
    else:
        x_ref, w_ref, b_ref = refs[:-1]
        r_ref = None

    def epilogue(acc):
        y = acc + b_ref[...].astype(jnp.float32)
        if r_ref is not None:
            y = y + r_ref[...].astype(jnp.float32)
        if act == "relu":
            y = jnp.maximum(y, 0.0)
        elif act == "sigmoid":
            y = _sigmoid(y)
        o_ref[...] = y.astype(o_ref.dtype)

    if nk == 1:
        epilogue(jnp.dot(x_ref[...], w_ref[...],
                         preferred_element_type=jnp.float32))
    else:
        k = pl.program_id(2)

        @pl.when(k == 0)
        def _():
            acc_ref[...] = jnp.zeros_like(acc_ref)

        acc_ref[...] += jnp.dot(x_ref[...], w_ref[...],
                                preferred_element_type=jnp.float32)

        @pl.when(k == nk - 1)
        def _():
            epilogue(acc_ref[...])


def _gru_kernel(f_ref, u_ref, n_ref, h_ref, o_ref):
    """new_h = sigmoid(f)*h*(1-sigmoid(u)) + sigmoid(u)*tanh(n)."""
    f = _sigmoid(f_ref[...].astype(jnp.float32))
    u = _sigmoid(u_ref[...].astype(jnp.float32))
    nv = jnp.tanh(n_ref[...].astype(jnp.float32))
    h = h_ref[...].astype(jnp.float32)
    o_ref[...] = (f * h * (1.0 - u) + u * nv).astype(o_ref.dtype)


# --------------------------------------------------------------------------
# Pallas wrappers
# --------------------------------------------------------------------------
def _pack_matmul(w2d, b):
    """Pre-reshape/pad weights ONCE at init: w2d [K, N] -> bf16 [Kp, Np]."""
    K, N = w2d.shape
    TN = min(256, _round_up(N, 128))
    Np = _round_up(N, TN)
    if K <= 512:
        TK = _round_up(K, 128)          # single K step, no accumulator scratch
    else:
        TK = 256                        # MXU-shaped K tile
    Kp = _round_up(K, TK)
    wp = jnp.pad(w2d, ((0, Kp - K), (0, Np - N))).astype(jnp.bfloat16)
    bp = jnp.pad(b, (0, Np - N)).reshape(1, Np).astype(jnp.float32)
    return {"w": wp, "b": bp, "K": K, "N": N,
            "Kp": Kp, "Np": Np, "TK": TK, "TN": TN}


def matmul_fused(x, packed, residual=None, act="none"):
    """x: [M, K] f32, packed: pre-padded bf16 weights; returns [M, N] f32."""
    M, K = x.shape
    Kp, Np, TK, TN = packed["Kp"], packed["Np"], packed["TK"], packed["TN"]
    N = packed["N"]

    TM = min(256, _round_up(M, 8))
    Mp = _round_up(M, TM)
    nm, nn, nk = Mp // TM, Np // TN, Kp // TK

    xp = jnp.pad(x, ((0, Mp - M), (0, Kp - K))).astype(jnp.bfloat16)

    in_arrays = [xp, packed["w"], packed["b"]]
    in_specs = [
        pl.BlockSpec((TM, TK), lambda m, n, k: (m, k)),
        pl.BlockSpec((TK, TN), lambda m, n, k: (k, n)),
        pl.BlockSpec((1, TN), lambda m, n, k: (0, n)),
    ]
    has_res = residual is not None
    if has_res:
        rp = jnp.pad(residual, ((0, Mp - M), (0, Np - N))).astype(jnp.bfloat16)
        in_arrays.append(rp)
        in_specs.append(pl.BlockSpec((TM, TN), lambda m, n, k: (m, n)))

    scratch = () if nk == 1 else (pltpu.VMEM((TM, TN), jnp.float32),)

    out = pl.pallas_call(
        functools.partial(_mm_kernel, nk=nk, has_res=has_res, act=act),
        out_shape=jax.ShapeDtypeStruct((Mp, Np), jnp.float32),
        grid_spec=pltpu.PrefetchScalarGridSpec(
            num_scalar_prefetch=0,
            grid=(nm, nn, nk),
            in_specs=in_specs,
            out_specs=pl.BlockSpec((TM, TN), lambda m, n, k: (m, n)),
            scratch_shapes=scratch,
        ),
        compiler_params=pltpu.CompilerParams(
            dimension_semantics=("parallel", "parallel", "arbitrary"),
            vmem_limit_bytes=32 * 1024 * 1024),
    )(*in_arrays)
    return out[:M, :N]


def gru_update(f_v, u_v, n_v, h):
    """Fused gate computation of HiddenUpdater. All inputs [..., hd] NHWC."""
    lead = h.shape[:-1]
    hd = h.shape[-1]
    fv, uv, nv, hv = (a.reshape(-1, hd) for a in (f_v, u_v, n_v, h))
    M = hv.shape[0]
    Cp = _round_up(hd, 128)
    TM = min(256, _round_up(M, 8))
    Mp = _round_up(M, TM)

    def _pad(a):
        return jnp.pad(a, ((0, Mp - M), (0, Cp - hd)))

    out = pl.pallas_call(
        _gru_kernel,
        out_shape=jax.ShapeDtypeStruct((Mp, Cp), jnp.float32),
        grid_spec=pltpu.PrefetchScalarGridSpec(
            num_scalar_prefetch=0,
            grid=(Mp // TM,),
            in_specs=[pl.BlockSpec((TM, Cp), lambda m: (m, 0))
                      for _ in range(4)],
            out_specs=pl.BlockSpec((TM, Cp), lambda m: (m, 0)),
        ),
        compiler_params=pltpu.CompilerParams(
            dimension_semantics=("parallel",)),
    )(_pad(fv), _pad(uv), _pad(nv), _pad(hv))
    return out[:M, :hd].reshape(*lead, hd)


# --------------------------------------------------------------------------
# Plain-JAX data-movement glue (im2col, interpolation, layout)
# --------------------------------------------------------------------------
def _im2col(x, kh, kw, pad, stride=1):
    B, H, W, C = x.shape
    Ho = (H + 2 * pad - kh) // stride + 1
    Wo = (W + 2 * pad - kw) // stride + 1
    xp = jnp.pad(x, ((0, 0), (pad, pad), (pad, pad), (0, 0)))
    cols = []
    for di in range(kh):
        for dj in range(kw):
            cols.append(xp[:, di:di + stride * (Ho - 1) + 1:stride,
                            dj:dj + stride * (Wo - 1) + 1:stride, :])
    patches = jnp.concatenate(cols, axis=-1)
    return patches.reshape(B * Ho * Wo, kh * kw * C), (B, Ho, Wo)


def conv2d(x, p, *, pad, act="none", residual=None):
    """NHWC conv (stride 1) with fused bias/residual/activation epilogue."""
    kh, kw = p["kh"], p["kw"]
    B, H, W, C = x.shape
    if kh == 1 and kw == 1 and pad == 0:
        xm, (Bo, Ho, Wo) = x.reshape(B * H * W, C), (B, H, W)
    else:
        xm, (Bo, Ho, Wo) = _im2col(x, kh, kw, pad)
    res = None if residual is None else residual.reshape(Bo * Ho * Wo, p["N"])
    out = matmul_fused(xm, p, residual=res, act=act)
    return out.reshape(Bo, Ho, Wo, p["N"])


def _up2x_axis(x, axis):
    """1-D x2 linear upsample, half-pixel centers (align_corners=False)."""
    n = x.shape[axis]
    first = lax.slice_in_dim(x, 0, 1, axis=axis)
    last = lax.slice_in_dim(x, n - 1, n, axis=axis)
    prev = jnp.concatenate([first, lax.slice_in_dim(x, 0, n - 1, axis=axis)],
                           axis=axis)
    nxt = jnp.concatenate([lax.slice_in_dim(x, 1, n, axis=axis), last],
                          axis=axis)
    even = 0.75 * x + 0.25 * prev
    odd = 0.75 * x + 0.25 * nxt
    stacked = jnp.stack([even, odd], axis=axis + 1)
    shp = list(x.shape)
    shp[axis] = 2 * n
    return stacked.reshape(shp)


def upsample2x_bilinear(x):                      # NHWC
    return _up2x_axis(_up2x_axis(x, 1), 2)


def avgpool_area(x, k):                          # F.interpolate mode='area'
    B, H, W, C = x.shape
    return x.reshape(B, H // k, k, W // k, k, C).mean(axis=(2, 4))


def _to_nhwc(x):                                 # [B,C,H,W] -> [B,H,W,C]
    return jnp.transpose(x, (0, 2, 3, 1)).astype(jnp.float32)


def _group_to_nhwc(g):                           # [B,N,C,H,W] -> [B*N,H,W,C]
    B, N, C, H, W = g.shape
    return jnp.transpose(g.reshape(B * N, C, H, W), (0, 2, 3, 1)).astype(jnp.float32)


def _group_from_nhwc(x, B, N):                   # [B*N,H,W,C] -> [B,N,C,H,W]
    BN, H, W, C = x.shape
    return jnp.transpose(x, (0, 3, 1, 2)).reshape(B, N, C, H, W)


# --------------------------------------------------------------------------
# Module forward passes (match the PyTorch Decoder semantics)
# --------------------------------------------------------------------------
def group_resblock(g, p):
    """out = conv2(relu(conv1(relu(g)))) + (downsample(g) or g)."""
    a = jnp.maximum(g, 0.0)
    out = conv2d(a, p["conv1"], pad=1, act="relu")          # relu fused for conv2 input
    res = g if "down" not in p else conv2d(g, p["down"], pad=1)
    return conv2d(out, p["conv2"], pad=1, residual=res)      # residual fused


def cbam(x, p):
    """Channel gate (avg+max pool -> shared MLP -> sigmoid) then spatial gate."""
    BN, H, W, C = x.shape
    pooled = jnp.concatenate([jnp.mean(x, axis=(1, 2)),
                              jnp.max(x, axis=(1, 2))], axis=0)   # [2*BN, C]
    hidden = matmul_fused(pooled, p["mlp1"], act="relu")
    att = matmul_fused(hidden, p["mlp2"])
    scale_c = jax.nn.sigmoid(att[:BN] + att[BN:])                  # [BN, C]
    x = x * scale_c[:, None, None, :]
    comp = jnp.concatenate([jnp.max(x, axis=-1, keepdims=True),
                            jnp.mean(x, axis=-1, keepdims=True)], axis=-1)
    smap = conv2d(comp, p["spatial"], pad=3, act="sigmoid")        # [BN,H,W,1]
    return x * smap


def feature_fusion(x_nhwc, g_flat, B, N, p):
    Cx = x_nhwc.shape[-1]
    H, W = x_nhwc.shape[1:3]
    x_exp = jnp.broadcast_to(x_nhwc[:, None], (B, N, H, W, Cx)).reshape(B * N, H, W, Cx)
    g = jnp.concatenate([x_exp, g_flat], axis=-1)       # MainToGroupDistributor 'cat'
    g = group_resblock(g, p["block1"])
    r = cbam(g, p["cbam"])
    return group_resblock(g + r, p["block2"])


def upsample_block(skip_nhwc, up_g, B, N, p):
    skip = conv2d(skip_nhwc, p["skip_conv"], pad=1)
    g = upsample2x_bilinear(up_g)
    H, W, C = g.shape[1:]
    skip_exp = jnp.broadcast_to(skip[:, None], (B, N, H, W, C)).reshape(B * N, H, W, C)
    return group_resblock(g + skip_exp, p["out_conv"])   # distributor 'add'


def hidden_updater(g16, g8, g4cat, h, p):
    # sum of three 1x1 convs; the adds are fused into the matmul epilogues
    a = conv2d(g16, p["g16_conv"], pad=0)
    b = conv2d(avgpool_area(g8, 2), p["g8_conv"], pad=0, residual=a)
    c = conv2d(avgpool_area(g4cat, 4), p["g4_conv"], pad=0, residual=b)
    gin = jnp.concatenate([c, h], axis=-1)
    values = conv2d(gin, p["transform"], pad=1)           # [BN,H,W,3*hd]
    hd = h.shape[-1]
    return gru_update(values[..., :hd], values[..., hd:2 * hd],
                      values[..., 2 * hd:], h)


def decoder_forward(params, f16, f8, f4, hidden_state, memory_readout, h_out=True):
    B, N = memory_readout.shape[:2]
    f16h, f8h, f4h = _to_nhwc(f16), _to_nhwc(f8), _to_nhwc(f4)
    h = _group_to_nhwc(hidden_state)
    mr = _group_to_nhwc(memory_readout)

    if params.get("hidden_update") is not None:
        g_in = jnp.concatenate([mr, h], axis=-1)
    else:
        g_in = mr

    g16 = feature_fusion(f16h, g_in, B, N, params["fuser"])
    g8 = upsample_block(f8h, g16, B, N, params["up_16_8"])
    g4 = upsample_block(f4h, g8, B, N, params["up_8_4"])

    logits = conv2d(jnp.maximum(g4, 0.0), params["pred"], pad=1)   # [BN,H4,W4,1]

    if h_out and params.get("hidden_update") is not None:
        g4cat = jnp.concatenate([g4, logits], axis=-1)
        new_h = hidden_updater(g16, g8, g4cat, h, params["hidden_update"])
        new_h5 = _group_from_nhwc(new_h, B, N)
    else:
        new_h5 = None

    return new_h5, (_group_from_nhwc(g16, B, N),
                    _group_from_nhwc(g8, B, N),
                    _group_from_nhwc(g4, B, N))


# --------------------------------------------------------------------------
# Parameter construction (deterministic random params, shapes from __init__)
# --------------------------------------------------------------------------
def _conv_param(key, kh, kw, cin, cout):
    k1, k2 = jax.random.split(key)
    w = jax.random.normal(k1, (kh, kw, cin, cout), jnp.float32) / jnp.sqrt(kh * kw * cin)
    b = 0.05 * jax.random.normal(k2, (cout,), jnp.float32)
    p = _pack_matmul(w.reshape(kh * kw * cin, cout), b)
    p.update(kh=kh, kw=kw)
    return p


def _linear_param(key, cin, cout):
    return _conv_param(key, 1, 1, cin, cout)


def _init_group_resblock(key, in_dim, out_dim):
    ks = jax.random.split(key, 3)
    p = {"conv1": _conv_param(ks[0], 3, 3, in_dim, out_dim),
         "conv2": _conv_param(ks[1], 3, 3, out_dim, out_dim)}
    if in_dim != out_dim:
        p["down"] = _conv_param(ks[2], 3, 3, in_dim, out_dim)
    return p


def _init_cbam(key, C, reduction=16):
    ks = jax.random.split(key, 3)
    return {"mlp1": _linear_param(ks[0], C, C // reduction),
            "mlp2": _linear_param(ks[1], C // reduction, C),
            "spatial": _conv_param(ks[2], 7, 7, 2, 1)}


def _init_feature_fusion(key, x_in, g_in, g_mid, g_out):
    ks = jax.random.split(key, 3)
    return {"block1": _init_group_resblock(ks[0], x_in + g_in, g_mid),
            "cbam": _init_cbam(ks[1], g_mid),
            "block2": _init_group_resblock(ks[2], g_mid, g_out)}


def _init_upsample_block(key, skip_dim, up_dim, out_dim):
    ks = jax.random.split(key, 2)
    return {"skip_conv": _conv_param(ks[0], 3, 3, skip_dim, up_dim),
            "out_conv": _init_group_resblock(ks[1], up_dim, out_dim)}


def _init_hidden_updater(key, g_dims, mid_dim, hidden_dim):
    ks = jax.random.split(key, 4)
    return {"g16_conv": _conv_param(ks[0], 1, 1, g_dims[0], mid_dim),
            "g8_conv": _conv_param(ks[1], 1, 1, g_dims[1], mid_dim),
            "g4_conv": _conv_param(ks[2], 1, 1, g_dims[2], mid_dim),
            "transform": _conv_param(ks[3], 3, 3, mid_dim + hidden_dim, hidden_dim * 3)}


def init_decoder(key, val_dim, hidden_dim):
    ks = jax.random.split(key, 5)
    p = {"fuser": _init_feature_fusion(ks[0], 1024, val_dim + hidden_dim, 512, 512),
         "up_16_8": _init_upsample_block(ks[1], 512, 512, 256),
         "up_8_4": _init_upsample_block(ks[2], 256, 256, 256),
         "pred": _conv_param(ks[3], 3, 3, 256, 1)}
    if hidden_dim > 0:
        p["hidden_update"] = _init_hidden_updater(ks[4], [512, 256, 256 + 1],
                                                  256, hidden_dim)
    else:
        p["hidden_update"] = None
    return p


# --------------------------------------------------------------------------
if __name__ == "__main__":
    key = jax.random.PRNGKey(0)
    kp, kf16, kf8, kf4, kh, km = jax.random.split(key, 6)

    B, N = 1, 2                       # batch, num_objects
    val_dim, hidden_dim = 32, 16      # small but consistent with the module
    H16, W16 = 4, 4

    params = init_decoder(kp, val_dim, hidden_dim)

    f16 = jax.random.normal(kf16, (B, 1024, H16, W16), jnp.float32)
    f8 = jax.random.normal(kf8, (B, 512, 2 * H16, 2 * W16), jnp.float32)
    f4 = jax.random.normal(kf4, (B, 256, 4 * H16, 4 * W16), jnp.float32)
    hidden_state = jax.random.normal(kh, (B, N, hidden_dim, H16, W16), jnp.float32)
    memory_readout = jax.random.normal(km, (B, N, val_dim, H16, W16), jnp.float32)

    new_hidden, (g16, g8, g4) = decoder_forward(
        params, f16, f8, f4, hidden_state, memory_readout, h_out=True)
    jax.block_until_ready((new_hidden, g16, g8, g4))

    assert new_hidden.shape == (B, N, hidden_dim, H16, W16), new_hidden.shape
    assert g16.shape == (B, N, 512, H16, W16), g16.shape
    assert g8.shape == (B, N, 256, 2 * H16, 2 * W16), g8.shape
    assert g4.shape == (B, N, 256, 4 * H16, 4 * W16), g4.shape

    print("KERNEL_OK")
</pallas_src>

<mosaic_0001>
module attributes {stable_mosaic.version = 11 : i64} {
  func.func @_mm_kernel(%arg0: i32, %arg1: i32, %arg2: i32, %arg3: memref<32x256xbf16, #tpu.memory_space<vmem>>, %arg4: memref<256x256xbf16, #tpu.memory_space<vmem>>, %arg5: memref<1x256xf32, #tpu.memory_space<vmem>>, %arg6: memref<32x256xf32, #tpu.memory_space<vmem>>, %arg7: memref<32x256xf32, #tpu.memory_space<vmem>>) attributes {dimension_semantics = [#tpu.dimension_semantics<parallel>, #tpu.dimension_semantics<parallel>, #tpu.dimension_semantics<arbitrary>], iteration_bounds = array<i64: 1, 2, 38>, scalar_prefetch = 0 : i64, scratch_operands = 1 : i64, tpu.core_type = #tpu.core_type<tc>, window_params = [{transform_indices = @transform_0, window_bounds = array<i64: 32, 256>}, {transform_indices = @transform_1, window_bounds = array<i64: 256, 256>}, {transform_indices = @transform_2, window_bounds = array<i64: 1, 256>}, {transform_indices = @transform_3, window_bounds = array<i64: 32, 256>}]} {
    %c0_i32 = arith.constant 0 : i32
    %0 = arith.cmpi eq, %arg2, %c0_i32 : i32
    %1 = arith.extui %0 : i1 to i32
    %c0_i32_0 = arith.constant 0 : i32
    %2 = arith.cmpi ne, %1, %c0_i32_0 : i32
    scf.if %2 {
      %cst_9 = arith.constant 0.000000e+00 : f32
      %12 = vector.broadcast %cst_9 : f32 to vector<32x256xf32>
      %c0_10 = arith.constant 0 : index
      %c0_11 = arith.constant 0 : index
      %13 = vector.load %arg7[%c0_10, %c0_11] : memref<32x256xf32, #tpu.memory_space<vmem>>, vector<32x256xf32>
      tpu.vector_store %arg7[%c0_10, %c0_11], %12 {strides = array<i32>} : memref<32x256xf32, #tpu.memory_space<vmem>>, vector<32x256xf32>,
    } else {
    }
    %c0 = arith.constant 0 : index
    %c0_1 = arith.constant 0 : index
    %3 = vector.load %arg7[%c0, %c0_1] : memref<32x256xf32, #tpu.memory_space<vmem>>, vector<32x256xf32>
    %c0_2 = arith.constant 0 : index
    %c0_3 = arith.constant 0 : index
    %4 = vector.load %arg3[%c0_2, %c0_3] : memref<32x256xbf16, #tpu.memory_space<vmem>>, vector<32x256xbf16>
    %c0_4 = arith.constant 0 : index
    %c0_5 = arith.constant 0 : index
    %5 = vector.load %arg4[%c0_4, %c0_5] : memref<256x256xbf16, #tpu.memory_space<vmem>>, vector<256x256xbf16>
    %cst = arith.constant dense<0.000000e+00> : vector<32x256xf32>
    %6 = tpu.matmul %4, %5, %cst {dimension_numbers = #tpu.dot_dimension_numbers<[1], [0], [0], [1], [0, 0, 1, 1], [], []>} : vector<32x256xbf16>, vector<256x256xbf16>, vector<32x256xf32> -> vector<32x256xf32>
    %7 = arith.addf %3, %6 : vector<32x256xf32>
    %c0_6 = arith.constant 0 : index
    %c0_7 = arith.constant 0 : index
    %8 = vector.load %arg7[%c0_6, %c0_7] : memref<32x256xf32, #tpu.memory_space<vmem>>, vector<32x256xf32>
    tpu.vector_store %arg7[%c0_6, %c0_7], %7 {strides = array<i32>} : memref<32x256xf32, #tpu.memory_space<vmem>>, vector<32x256xf32>,
    %c37_i32 = arith.constant 37 : i32
    %9 = arith.cmpi eq, %arg2, %c37_i32 : i32
    %10 = arith.extui %9 : i1 to i32
    %c0_i32_8 = arith.constant 0 : i32
    %11 = arith.cmpi ne, %10, %c0_i32_8 : i32
    scf.if %11 {
      %c0_9 = arith.constant 0 : index
      %c0_10 = arith.constant 0 : index
      %12 = vector.load %arg7[%c0_9, %c0_10] : memref<32x256xf32, #tpu.memory_space<vmem>>, vector<32x256xf32>
      %c0_11 = arith.constant 0 : index
      %c0_12 = arith.constant 0 : index
      %13 = vector.load %arg5[%c0_11, %c0_12] : memref<1x256xf32, #tpu.memory_space<vmem>>, vector<1x256xf32>
      %14 = vector.broadcast %13 : vector<1x256xf32> to vector<32x256xf32>
      %15 = arith.addf %12, %14 : vector<32x256xf32>
      %cst_13 = arith.constant 0.000000e+00 : f32
      %16 = vector.broadcast %cst_13 : f32 to vector<32x256xf32>
      %17 = arith.maximumf %15, %16 : vector<32x256xf32>
      %c0_14 = arith.constant 0 : index
      %c0_15 = arith.constant 0 : index
      %18 = vector.load %arg6[%c0_14, %c0_15] : memref<32x256xf32, #tpu.memory_space<vmem>>, vector<32x256xf32>
      tpu.vector_store %arg6[%c0_14, %c0_15], %17 {strides = array<i32>} : memref<32x256xf32, #tpu.memory_space<vmem>>, vector<32x256xf32>,
    } else {
    }
    return
  }
  func.func @transform_0(%arg0: i32, %arg1: i32, %arg2: i32) -> (i32, i32) {
    %c0_i32 = arith.constant 0 : i32
    return %arg0, %arg2 : i32, i32
  }
  func.func @transform_1(%arg0: i32, %arg1: i32, %arg2: i32) -> (i32, i32) {
    %c0_i32 = arith.constant 0 : i32
    return %arg2, %arg1 : i32, i32
  }
  func.func @transform_2(%arg0: i32, %arg1: i32, %arg2: i32) -> (i32, i32) {
    %c0_i32 = arith.constant 0 : i32
    %c0_i32_0 = arith.constant 0 : i32
    return %c0_i32, %arg1 : i32, i32
  }
  func.func @transform_3(%arg0: i32, %arg1: i32, %arg2: i32) -> (i32, i32) {
    %c0_i32 = arith.constant 0 : i32
    return %arg0, %arg1 : i32, i32
  }
}

</mosaic_0001>

<bundles_post_ra>
// kernel: tpu_custom_call.1
= control target key start
LH: loop header
LB: loop body
LE: loop exit
PB: predicated region body
PF: predicated region fallthrough
CT: control target
= control target key end

     0   :  { %s1862_s0 = inlined_call_operand.hbm [shape: bf16[32,9728], index: 0, kind: input, shape index: {}]   ;;  %s1863_s1 = inlined_call_operand.hbm [shape: bf16[9728,512], index: 1, kind: input, shape index: {}]   ;;  %s1864_s2 = inlined_call_operand.hbm [shape: f32[1,512], index: 2, kind: input, shape index: {}]   ;;  %s1865_s3 = inlined_call_operand.hbm [shape: f32[32,512], index: 3, kind: output, shape index: {}]  }
   0x1   :  { %1874 = sst [smem:[#allocation22_spill]] %s1862_s0 }
   0x2   :  { %1875 = sst [smem:[#allocation23_spill]] %s1863_s1 }
   0x3   :  { %1876 = sst [smem:[#allocation24_spill]] %s1865_s3 }
   0x4   :  { %8 = vsyncpa [#allocation4], 0 }
   0x5   :  { %10 = vsyncpa [#allocation4 + $0x1], 0 }
   0x6   :  { %11 = vsyncpa [#allocation7], 0 }
   0x7   :  { %13 = vsyncpa [#allocation7 + $0x1], 0 }
   0x8   :  { %14 = vsyncpa [#allocation5], 0 }
   0x9   :  { %16 = vsyncpa [#allocation5 + $0x1], 0  ;;  %s1462_s12 = smov 0   ;;  %s1464_s13 = smov 0  }
   0xa   :  { %s1466_s14 = smov 0   ;;  %s1468_s15 = smov 0  }
   0xb   :  { %s1470_s16 = smov 0   ;;  %s1472_s17 = smov 0  }
   0xc   :  { %s1474_s18 = smov 0   ;;  %s1476_s19 = smov 0  }
   0xd   :  { %s1478_s20 = smov 0   ;;  %s1480_s21 = smov 0  }
   0xe   :  { %s1482_s22 = smov 0   ;;  %s1484_s23 = smov 0  }
   0xf   :  { %s1486_s24 = smov 0   ;;  %s1488_s25 = smov 0  }
  0x10 LB: > { %1877 = sst [smem:[#allocation14_spill]] %s1400_s17  ;;  %s34_s26 = sadd.s32 1, %s1424_s23  ;;  %s1432_s25 = sphi %s1488_s25, %s22_s25   ;;  %s1428_s24 = sphi %s1486_s24, %s1906_s24   ;;  %s1424_s23 = sphi %s1484_s23, %s1905_s23   ;;  %s1420_s22 = sphi %s1482_s22, %s1904_s22   ;;  %s1416_s21 = sphi %s1480_s21, %s1914_s21   ;;  %s1412_s20 = sphi %s1478_s20, %s1902_s20   ;;  %s1408_s19 = sphi %s1476_s19, %s1913_s19   ;;  %s1404_s18 = sphi %s1474_s18, %s1912_s18   ;;  %s1400_s17 = sphi %s1472_s17, %s1900_s17   ;;  %s1396_s16 = sphi %s1470_s16, %s1911_s16   ;;  %s1392_s15 = sphi %s1468_s15, %s1910_s15   ;;  %s1388_s14 = sphi %s1466_s14, %s1909_s14   ;;  %s1384_s13 = sphi %s1464_s13, %s1908_s13   ;;  %s1380_s12 = sphi %s1462_s12, %s1907_s12  }
  0x11   : > { %1878 = sst [smem:[#allocation15_spill]] %s1412_s20  ;;  %s37_s27 = sadd.s32 1, %s1428_s24 }
  0x12   : > { %1879 = sst [smem:[#allocation16_spill]] %s1424_s23  ;;  %p35_p0 = scmp.ge.s32.totalorder %s34_s26, 38 }
  0x13   : > { %1880 = sst [smem:[#allocation17_spill]] %s1428_s24  ;;  %p58_p1 = scmp.eq.s32.totalorder %s1432_s25, 0 }
  0x14   : > { %p85_p2 = scmp.ne.s32.totalorder %s1400_s17, %s1396_s16  ;;  %s1916_s26 = smov (%p35_p0, %s34_s26), 0 }
  0x15   : > { %1881 = sst [smem:[#allocation18_spill]] %s1916_s26  ;;  %s1918_s27 = smov (!%p35_p0, %s37_s27), %s1428_s24 }
  0x16   : > { %s1545_s29 = ssub.s32 %s1424_s23, %s1916_s26  ;;  %p1549_p3 = por %p85_p2, %p58_p1 }
  0x17   : > { %p39_p4 = scmp.ge.s32.totalorder %s1918_s27, 2  ;;  %p48_p5 = scmp.eq.s32.totalorder %s1545_s29, 0 }
  0x18   : > { %p91_p6 = scmp.ne.s32.totalorder %s1396_s16, %s1392_s15  ;;  %p1066_p7 = scmp.lt.s32.totalorder %s1432_s25, 76 }
  0x19   : > { %s194_s4 = sand.u32 1, %s1432_s25   ;;  %s196_s5 = sand.u32 1, %s1400_s17  }
  0x1a   : > { %s842_s6 = sshll.u32 %s196_s5, 8  ;;  %s1868_s7 = sshll.u32 %s1428_s24, 1 }
  0x1b   : > { %s1006_s8 = sshll.u32 %s1424_s23, 7  ;;  %s198_s10 = scalar_lea.vmem [#allocation6], %s842_s6 }
  0x1c   : > { %s204_s9 = sadd.s32 %s1006_s8, %s1868_s7  ;;  %s209_s11 = sshll.u32 %s198_s10, 4  ;;  %s210_s11 = int_to_ptr.vmem [resolvable:$true] %s209_s11 }
  0x1d   : > { %s846_s28 = sshll.u32 %s204_s9, 2  ;;  %s1883_s1 = sld [smem:[#allocation23_spill]] }
  0x1e   : > { %p1056_p8 = pnand %p1066_p7, %p1549_p3  ;;  %s1571_s8 = scalar_lea.sflag [#allocation7], %s194_s4 }
  0x1f   : > { %s1434_s9 = smov 256   ;;  %s1435_s10 = smov 128  }
  0x20   : > { %s1436_s7 = smov 8   ;;  %p849_p9 = scmp.ge.s32.totalorder %s1432_s25, 1 }
  0x21   : > { %p236_p10 = scmp.lt.s32.totalorder %s1432_s25, 77  ;;  %s50_s26 = sadd.s32 1, %s1412_s20 }
  0x22   : > { %p57_p12 = scmp.ne.s32.totalorder %s1412_s20, %s1408_s19  ;;  %p63_p13 = scmp.ne.s32.totalorder %s1408_s19, %s1404_s18 }
  0x23   : > { %s206_s5 = scalar_lea.hbm %s1883_s1, %s846_s28  ;;  %p1576_p11 = pnand %p849_p9, %p236_p10 }
  0x24   : > { %s207_s6 = sshll.u32 %s206_s5, 4  ;;  %s169_s30 = sand.u32 1, %s1412_s20   ;;  %s208_s6 = int_to_ptr.hbm [resolvable:$true] %s207_s6 }
  0x25   : > { %1058 = dma.hbm_to_vmem [thread:$0]  (!%p1056_p8), %s208_s6, 4096, %s210_s11, %s1571_s8, %s1434_s9, %s1435_s10, %s1436_s7  }
  0x26   : > { %s1584_s28 = scalar_select %p48_p5, %s1412_s20, %s50_s26  }
  0x27   : > { %s1005_s4 = sshll.u32 %s1424_s23, 3  ;;  %p59_p0 = por %p58_p1, %p57_p12 }
  0x28   : > { %1885 = sst [smem:[#allocation19_spill]] %s1584_s28  ;;  %s839_s11 = sshll.u32 %s169_s30, 5 }
  0x29   : > { %s1886_s0 = sld [smem:[#allocation22_spill]]  ;;  %s173_s1 = scalar_lea.vmem [#allocation3], %s839_s11 }
  0x2a   : > { %s184_s28 = sshll.u32 %s173_s1, 4  ;;  %p1053_p2 = pnand %p1066_p7, %p59_p0  ;;  %s185_s28 = int_to_ptr.vmem [resolvable:$true] %s184_s28 }
  0x2b   : > { %s170_s5 = scalar_lea.sflag [#allocation4], %s169_s30  ;;  %s1600_s6 = sadd.s32 4294967295, %s1432_s25  }
  0x2c   : > { %s836_s1 = sadd.s32 4294967294, %s1432_s25   ;;  %s1920_s27 = smov (%p39_p4, %s1918_s27), 0 }
  0x2d   : > { %1887 = sst [smem:[#allocation20_spill]] %s1920_s27  ;;  %p64_p3 = scmp.eq.s32.totalorder %s1600_s6, 0 }
  0x2e   : > { %s104_s30 = sadd.s32 1, %s1388_s14  ;;  %p111_p5 = scmp.ne.s32.totalorder %s1388_s14, %s1384_s13 }
  0x2f   : > { %s181_s9 = scalar_lea.hbm %s1886_s0, %s1005_s4  ;;  %s1437_s4 = smov 4864  }
  0x30   : > { %s182_s26 = sshll.u32 %s181_s9, 4  ;;  %p1619_p8 = por %p64_p3, %p63_p13  ;;  %s183_s26 = int_to_ptr.hbm [resolvable:$true] %s182_s26 }
  0x31   : > { %1055 = dma.hbm_to_vmem [thread:$0]  (!%p1053_p2), %s183_s26, 512, %s185_s28, %s170_s5, %s1437_s4, %s1435_s10, %s1436_s7  }
  0x32   : > { %s74_s7 = ssub.s32 %s1428_s24, %s1920_s27  ;;  %p1629_p4 = por %p91_p6, %p64_p3 }
  0x33   : > { %s75_s28 = sor.u32 %s74_s7, %s1545_s29  ;;  %p102_p10 = scmp.eq.s32.totalorder %s74_s7, 0 }
  0x34   : > { %p76_p9 = scmp.eq.s32.totalorder %s75_s28, 0  ;;  %p1638_p12 = por %p111_p5, %p58_p1 }
  0x35   : > { %s1891_s18 = sadd.s32 1, %s1400_s17  ;;  %p117_p13 = scmp.ne.s32.totalorder %s1384_s13, %s1380_s12 }
  0x36   : > { %s1645_s26 = scalar_select %p76_p9, %s1400_s17, %s1891_s18  }
  0x37   : > { %s1648_s29 = scalar_select %p102_p10, %s1388_s14, %s104_s30  }
  0x38   : > { %1892 = sst [smem:[#allocation21_spill]] %s1645_s26  ;;  %p143_p6 = scmp.eq.s32.totalorder %s1600_s6, 75 }
  0x39   : > { %p149_p0 = scmp.eq.s32.totalorder %s836_s1, 75  ;;  %s221_s15 = sand.u32 1, %s1388_s14  }
  0x3a   : > { %p1656_p2 = por %p117_p13, %p64_p3  ;;  %p1663_p1 = por %p143_p6, %p111_p5 }
  0x3b   : > { %p1667_p9 = por %p149_p0, %p117_p13  ;;  %s847_s30 = sshll.u32 %s221_s15, 1 }
  0x3c   : > { %s1896_s28 = sshll.u32 %s1428_s24, 1  ;;  %s223_s23 = scalar_lea.vmem [#allocation8], %s847_s30 }
  0x3d   : > { %s227_s1 = scalar_lea.hbm %s1864_s2, %s1896_s28  ;;  %s231_s20 = sshll.u32 %s223_s23, 4  ;;  %s232_s20 = int_to_ptr.vmem [resolvable:$true] %s231_s20 }
  0x3e   : > { %s229_s27 = sshll.u32 %s227_s1, 4  ;;  %p1059_p3 = pnand %p1066_p7, %p1638_p12  ;;  %s230_s27 = int_to_ptr.hbm [resolvable:$true] %s229_s27 }
  0x3f   : > { %240 = sbr.rel (%p1576_p11) target bundleno = 327 (0x147), region = 32  ;;  %s242_s15 = sand.u32 (!%p1576_p11), 1, %s1408_s19  }
  0x40   : > { %1061 = dma.hbm_to_vmem [thread:$0]  (!%p1059_p3), %s230_s27, 32, %s232_s20, %s1571_s8  }
  0x41   : > { %s850_s24 = sshll.u32 (!%p1576_p11), %s242_s15, 5  ;;  %s243_s26 = scalar_lea.sflag (!%p1576_p11), [#allocation4], %s242_s15 }
  0x42   : > { %s1684_s17 = scalar_lea.vmem (!%p1576_p11), [#allocation3], %s850_s24 }
  0x44   : > { %1363 = dma.done.wait (%p1619_p8), %s243_s26, 512  }
  0x45   : > { %1365 = vsyncadd (%p1619_p8), %s243_s26, 4294966784  ;;  %s252_s0 = sand.u32 1, %s1600_s6   ;;  %s254_s20 = sand.u32 1, %s1396_s16  }
  0x46   : > { %s851_s23 = sshll.u32 %s254_s20, 8  ;;  %s253_s27 = scalar_lea.sflag [#allocation7], %s252_s0 }
  0x47   : > { %s1692_s8 = scalar_lea.vmem [#allocation6], %s851_s23 }
  0x48   : > { %1367 = dma.done.wait (%p1629_p4), %s253_s27, 4096  }
  0x49   : > { %1369 = vsyncadd (%p1629_p4), %s253_s27, 4294963200  ;;  %s1699_s24 = sand.u32 1, %s1384_s13  }
  0x4a   : > { %s852_s3 = sshll.u32 %s1699_s24, 1 }
  0x4b   : > { %s1702_s10 = scalar_lea.vmem [#allocation8], %s852_s3 }
  0x4c   : > { %1371 = dma.done.wait (%p1656_p2), %s253_s27, 32  }
  0x4d   : > { %1373 = vsyncadd (%p1656_p2), %s253_s27, 4294967264  ;;  %s853_s6 = sshll.u32 %s1699_s24, 6  ;;  %p854_p7 = scmp.ne.s32.totalorder %s1416_s21, 0 }
  0x4e   : > { %s1709_s9 = scalar_lea.vmem [#allocation9], %s853_s6 }
  0x4f   : > { %310 = sbr.rel (%p854_p7) target bundleno = 93 (0x5d), region = 48 }
  0x54   : > { %v1438_v0 = vmov 0.0  }
  0x55   : > { %311 = vst [vmem:[#allocation2 + $0x30] sm:$0xff] %v1438_v0 }
  0x56   : > { %312 = vst [vmem:[#allocation2] sm:$0xff] %v1438_v0 }
  0x57   : > { %313 = vst [vmem:[#allocation2 + $0x18] sm:$0xff] %v1438_v0 }
  0x58   : > { %314 = vst [vmem:[#allocation2 + $0x10] sm:$0xff] %v1438_v0 }
  0x59   : > { %315 = vst [vmem:[#allocation2 + $0x8] sm:$0xff] %v1438_v0 }
  0x5a   : > { %316 = vst [vmem:[#allocation2 + $0x20] sm:$0xff] %v1438_v0 }
  0x5b   : > { %317 = vst [vmem:[#allocation2 + $0x28] sm:$0xff] %v1438_v0 }
  0x5c   : > { %318 = vst [vmem:[#allocation2 + $0x38] sm:$0xff] %v1438_v0 }
  0x5d PF: > { %v929_v1 = vld [vmem:[%s1692_s8 + $0x70] sm:$0xf]  ;;  %v1026_v2 = vld [vmem:[%s1692_s8 + $0x74] sm:$0xf0]  ;;  %v1025_v6 = vld [vmem:[%s1692_s8 + $0x74] sm:$0xf] }
  0x5e   : > { %v993_v3 = vld [vmem:[%s1692_s8 + $0xf0] sm:$0xf]  ;;  %v930_v4 = vor.u32 %v1026_v2, %v929_v1  ;;  %v1042_v5 = vld [vmem:[%s1692_s8 + $0xf4] sm:$0xf0]  ;;  %v931_v7 = vld [vmem:[%s1692_s8 + $0x78] sm:$0xf0] }
  0x5f   : > { %v994_v8 = vor.u32 %v1042_v5, %v993_v3  ;;  %v934_v9 = vor.u32 %v1025_v6, %v931_v7  ;;  %v1041_v10 = vld [vmem:[%s1692_s8 + $0xf4] sm:$0xf]  ;;  %v995_v11 = vld [vmem:[%s1692_s8 + $0xf8] sm:$0xf0]  ;;  %v921_v12 = vld [vmem:[%s1692_s8 + $0x60] sm:$0xf] }
  0x60   : > { %543 = vmatpush.bf16.msra.mxu0 %v930_v4  ;;  %v998_v13 = vor.u32 %v1041_v10, %v995_v11  ;;  %v1024_v14 = vld [vmem:[%s1692_s8 + $0x64] sm:$0xf0]  ;;  %v985_v15 = vld [vmem:[%s1692_s8 + $0xe0] sm:$0xf]  ;;  %v1023_v19 = vld [vmem:[%s1692_s8 + $0x64] sm:$0xf] }
  0x61   : > { %v1040_v16 = vld [vmem:[%s1692_s8 + $0xe4] sm:$0xf0]  ;;  %562 = vmatpush.bf16.msra.mxu1 %v994_v8  ;;  %581 = vmatpush.bf16.msra.mxu2 %v934_v9  ;;  %v922_v17 = vor.u32 %v1024_v14, %v921_v12  ;;  %v923_v20 = vld [vmem:[%s1692_s8 + $0x68] sm:$0xf0]  ;;  %v1039_v21 = vld [vmem:[%s1692_s8 + $0xe4] sm:$0xf] }
  0x62   : > { %v986_v18 = vor.u32 %v1040_v16, %v985_v15  ;;  %600 = vmatpush.bf16.msra.mxu3 %v998_v13  ;;  %v926_v22 = vor.u32 %v1023_v19, %v923_v20  ;;  %v987_v23 = vld [vmem:[%s1692_s8 + $0xe8] sm:$0xf0]  ;;  %v913_v24 = vld [vmem:[%s1692_s8 + $0x50] sm:$0xf]  ;;  %v1022_v25 = vld [vmem:[%s1692_s8 + $0x54] sm:$0xf0] }
  0x63   : > { %v990_v26 = vor.u32 %v1039_v21, %v987_v23  ;;  %v977_v27 = vld [vmem:[%s1692_s8 + $0xd0] sm:$0xf]  ;;  %v1038_v28 = vld [vmem:[%s1692_s8 + $0xd4] sm:$0xf0]  ;;  %v1021_v29 = vld [vmem:[%s1692_s8 + $0x54] sm:$0xf]  ;;  %v914_v30 = vor.u32 %v1022_v25, %v913_v24 }
  0x64   : > { %544 = vmatpush.bf16.msra.mxu0 %v922_v17  ;;  %v915_v31 = vld [vmem:[%s1692_s8 + $0x58] sm:$0xf0]  ;;  %v1037_v32 = vld [vmem:[%s1692_s8 + $0xd4] sm:$0xf]  ;;  %v978_v34 = vor.u32 %v1038_v28, %v977_v27  ;;  %v905_v36 = vld [vmem:[%s1692_s8 + $0x40] sm:$0xf] }
  0x65   : > { %v979_v33 = vld [vmem:[%s1692_s8 + $0xd8] sm:$0xf0]  ;;  %563 = vmatpush.bf16.msra.mxu1 %v986_v18  ;;  %582 = vmatpush.bf16.msra.mxu2 %v926_v22  ;;  %v918_v35 = vor.u32 %v1021_v29, %v915_v31  ;;  %v1020_v37 = vld [vmem:[%s1692_s8 + $0x44] sm:$0xf0]  ;;  %v969_v38 = vld [vmem:[%s1692_s8 + $0xc0] sm:$0xf] }
  0x66   : > { %601 = vmatpush.bf16.msra.mxu3 %v990_v26  ;;  %v982_v39 = vor.u32 %v1037_v32, %v979_v33  ;;  %v1036_v40 = vld [vmem:[%s1692_s8 + $0xc4] sm:$0xf0]  ;;  %v1019_v41 = vld [vmem:[%s1692_s8 + $0x44] sm:$0xf]  ;;  %v907_v42 = vld [vmem:[%s1692_s8 + $0x48] sm:$0xf0]  ;;  %v906_v45 = vor.u32 %v1020_v37, %v905_v36 }
  0x67   : > { %v1035_v43 = vld [vmem:[%s1692_s8 + $0xc4] sm:$0xf]  ;;  %v971_v44 = vld [vmem:[%s1692_s8 + $0xc8] sm:$0xf0]  ;;  %v970_v46 = vor.u32 %v1036_v40, %v969_v38  ;;  %v910_v47 = vor.u32 %v1019_v41, %v907_v42  ;;  %v897_v48 = vld [vmem:[%s1692_s8 + $0x30] sm:$0xf] }
  0x68   : > { %545 = vmatpush.bf16.msra.mxu0 %v914_v30  ;;  %v1018_v49 = vld [vmem:[%s1692_s8 + $0x34] sm:$0xf0]  ;;  %v961_v50 = vld [vmem:[%s1692_s8 + $0xb0] sm:$0xf]  ;;  %v974_v51 = vor.u32 %v1035_v43, %v971_v44  ;;  %v1017_v53 = vld [vmem:[%s1692_s8 + $0x34] sm:$0xf] }
  0x69   : > { %564 = vmatpush.bf16.msra.mxu1 %v978_v34  ;;  %583 = vmatpush.bf16.msra.mxu2 %v918_v35  ;;  %v1034_v52 = vld [vmem:[%s1692_s8 + $0xb4] sm:$0xf0]  ;;  %v899_v54 = vld [vmem:[%s1692_s8 + $0x38] sm:$0xf0]  ;;  %v1033_v55 = vld [vmem:[%s1692_s8 + $0xb4] sm:$0xf]  ;;  %v898_v57 = vor.u32 %v1018_v49, %v897_v48 }
  0x6a   : > { %602 = vmatpush.bf16.msra.mxu3 %v982_v39  ;;  %v963_v56 = vld [vmem:[%s1692_s8 + $0xb8] sm:$0xf0]  ;;  %v962_v58 = vor.u32 %v1034_v52, %v961_v50  ;;  %v902_v59 = vor.u32 %v1017_v53, %v899_v54  ;;  %v889_v60 = vld [vmem:[%s1692_s8 + $0x20] sm:$0xf]  ;;  %v1016_v61 = vld [vmem:[%s1692_s8 + $0x24] sm:$0xf0] }
  0x6b   : > { %v953_v62 = vld [vmem:[%s1692_s8 + $0xa0] sm:$0xf]  ;;  %v966_v63 = vor.u32 %v1033_v55, %v963_v56  ;;  %v1032_v0 = vld [vmem:[%s1692_s8 + $0xa4] sm:$0xf0]  ;;  %v1015_v1 = vld [vmem:[%s1692_s8 + $0x24] sm:$0xf]  ;;  %v890_v5 = vor.u32 %v1016_v61, %v889_v60 }
  0x6c   : > { %546 = vmatpush.bf16.msra.mxu0 %v906_v45  ;;  %v891_v2 = vld [vmem:[%s1692_s8 + $0x28] sm:$0xf0]  ;;  %v1031_v3 = vld [vmem:[%s1692_s8 + $0xa4] sm:$0xf]  ;;  %v954_v6 = vor.u32 %v1032_v0, %v953_v62  ;;  %v881_v8 = vld [vmem:[%s1692_s8 + $0x10] sm:$0xf] }
  0x6d   : > { %565 = vmatpush.bf16.msra.mxu1 %v970_v46  ;;  %584 = vmatpush.bf16.msra.mxu2 %v910_v47  ;;  %v955_v4 = vld [vmem:[%s1692_s8 + $0xa8] sm:$0xf0]  ;;  %v894_v7 = vor.u32 %v1015_v1, %v891_v2  ;;  %v1014_v9 = vld [vmem:[%s1692_s8 + $0x14] sm:$0xf0]  ;;  %v945_v10 = vld [vmem:[%s1692_s8 + $0x90] sm:$0xf] }
  0x6e   : > { %603 = vmatpush.bf16.msra.mxu3 %v974_v51  ;;  %v958_v11 = vor.u32 %v1031_v3, %v955_v4  ;;  %v1030_v12 = vld [vmem:[%s1692_s8 + $0x94] sm:$0xf0]  ;;  %v1013_v13 = vld [vmem:[%s1692_s8 + $0x14] sm:$0xf]  ;;  %v883_v14 = vld [vmem:[%s1692_s8 + $0x18] sm:$0xf0]  ;;  %v882_v17 = vor.u32 %v1014_v9, %v881_v8 }
  0x6f   : > { %v1029_v15 = vld [vmem:[%s1692_s8 + $0x94] sm:$0xf]  ;;  %v947_v16 = vld [vmem:[%s1692_s8 + $0x98] sm:$0xf0]  ;;  %v946_v18 = vor.u32 %v1030_v12, %v945_v10  ;;  %v886_v19 = vor.u32 %v1013_v13, %v883_v14  ;;  %v873_v20 = vld [vmem:[%s1692_s8] sm:$0xf] }
  0x70   : > { %547 = vmatpush.bf16.msra.mxu0 %v898_v57  ;;  %v1012_v21 = vld [vmem:[%s1692_s8 + $0x4] sm:$0xf0]  ;;  %v937_v22 = vld [vmem:[%s1692_s8 + $0x80] sm:$0xf]  ;;  %v950_v23 = vor.u32 %v1029_v15, %v947_v16  ;;  %v1011_v25 = vld [vmem:[%s1692_s8 + $0x4] sm:$0xf] }
  0x71   : > { %566 = vmatpush.bf16.msra.mxu1 %v962_v58  ;;  %585 = vmatpush.bf16.msra.mxu2 %v902_v59  ;;  %v1028_v24 = vld [vmem:[%s1692_s8 + $0x84] sm:$0xf0]  ;;  %v875_v26 = vld [vmem:[%s1692_s8 + $0x8] sm:$0xf0]  ;;  %v1027_v27 = vld [vmem:[%s1692_s8 + $0x84] sm:$0xf]  ;;  %v874_v29 = vor.u32 %v1012_v21, %v873_v20 }
  0x72   : > { %604 = vmatpush.bf16.msra.mxu3 %v966_v63  ;;  %v939_v28 = vld [vmem:[%s1692_s8 + $0x88] sm:$0xf0]  ;;  %v857_v30 = vld [vmem:[%s1684_s17] sm:$0xf]  ;;  %v1008_v31 = vld [vmem:[%s1684_s17 + $0x4] sm:$0xf0]  ;;  %v938_v32 = vor.u32 %v1028_v24, %v937_v22  ;;  %v878_v33 = vor.u32 %v1011_v25, %v875_v26 }
  0x73   : > { %v1007_v34 = vld [vmem:[%s1684_s17 + $0x4] sm:$0xf]  ;;  %v859_v35 = vld [vmem:[%s1684_s17 + $0x8] sm:$0xf0]  ;;  %v942_v36 = vor.u32 %v1027_v27, %v939_v28  ;;  %v858_v37 = vor.u32 %v1008_v31, %v857_v30  ;;  %v865_v39 = vld [vmem:[%s1684_s17 + $0x10] sm:$0xf] }
  0x74   : > { %548 = vmatpush.bf16.msra.mxu0 %v890_v5  ;;  %v862_v38 = vor.u32 %v1007_v34, %v859_v35  ;;  %v1010_v40 = vld [vmem:[%s1684_s17 + $0x14] sm:$0xf0]  ;;  %v1009_v41 = vld [vmem:[%s1684_s17 + $0x14] sm:$0xf]  ;;  %v867_v42 = vld [vmem:[%s1684_s17 + $0x18] sm:$0xf0] }
  0x75   : > { %567 = vmatpush.bf16.msra.mxu1 %v954_v6  ;;  %586 = vmatpush.bf16.msra.mxu2 %v894_v7  ;;  %v866_v43 = vor.u32 %v1010_v40, %v865_v39  ;;  %v870_v44 = vor.u32 %v1009_v41, %v867_v42  ;;  %v319_v46 = vld [vmem:[#allocation2 + $0x30] sm:$0xff]  ;;  %v320_v51 = vld [vmem:[#allocation2] sm:$0xff]  ;;  %v321_v55 = vld [vmem:[#allocation2 + $0x18] sm:$0xff]  ;;  %p999_p11 = scmp.ne.s32.totalorder %s1416_s21, 37 }
  0x76   : > { %605 = vmatpush.bf16.msra.mxu3 %v958_v11  ;;  %v322_v61 = vld [vmem:[#allocation2 + $0x10] sm:$0xff]  ;;  %v323_v1 = vld [vmem:[#allocation2 + $0x8] sm:$0xff]  ;;  %v324_v7 = vld [vmem:[#allocation2 + $0x20] sm:$0xff] }
  0x77   : > { %v325_v11 = vld [vmem:[#allocation2 + $0x28] sm:$0xff] }
  0x78   : > { %549 = vmatpush.bf16.msra.mxu0 %v882_v17  ;;  %v326_v17 = vld [vmem:[#allocation2 + $0x38] sm:$0xff] }
  0x79   : > { %568 = vmatpush.bf16.msra.mxu1 %v946_v18  ;;  %587 = vmatpush.bf16.msra.mxu2 %v886_v19 }
  0x7a   : > { %606 = vmatpush.bf16.msra.mxu3 %v950_v23 }
  0x7c   : > { %550 = vmatpush.bf16.msra.mxu0 %v874_v29 }
  0x7d   : > { %569 = vmatpush.bf16.msra.mxu1 %v938_v32  ;;  %588 = vmatpush.bf16.msra.mxu2 %v878_v33 }
  0x7e   : > { %607 = vmatpush.bf16.msra.mxu3 %v942_v36 }
  0x7f   : > { %551 = vmatmul.bf16.vlgmr.msra.gmra.mxu0 %v858_v37 }
  0x80   : > { %570 = vmatmul.bf16.vlgmr.msra.gmra.mxu1 %v862_v38  ;;  %589 = vmatmul.bf16.vlgmr.msra.gmra.mxu2 %v858_v37 }
  0x81   : > { %608 = vmatmul.bf16.vlgmr.msra.gmra.mxu3 %v862_v38 }
  0x8f   : > { %556 = vmatmul.bf16.gmra.mxu0 %v866_v43 }
  0x90   : > { %575 = vmatmul.bf16.gmra.mxu1 %v870_v44  ;;  %594 = vmatmul.bf16.gmra.mxu2 %v866_v43 }
  0x91   : > { %613 = vmatmul.bf16.gmra.mxu3 %v870_v44 }
  0xfc   : > { %v552_v45 = vpop.f32.mrf.mxu0 }
  0xfd   : > { %v571_v47 = vpop.f32.mrf.mxu1 }
  0xfe   : > { %v572_v48 = vadd.f32 %v571_v47, %v552_v45 }
 0x100   : > { %v619_v49 = vadd.f32 %v572_v48, %v319_v46 }
 0x102   : > { %627 = vst [vmem:[#allocation2 + $0x30] sm:$0xff] %v619_v49 }
 0x103   : > { %v590_v50 = vpop.f32.mrf.mxu2 }
 0x104   : > { %v609_v52 = vpop.f32.mrf.mxu3  ;;  %v554_v53 = vpop.f32.mrf.mxu0 }
 0x105   : > { %v610_v54 = vadd.f32 %v609_v52, %v590_v50  ;;  %v573_v56 = vpop.f32.mrf.mxu1 }
 0x106   : > { %v574_v57 = vadd.f32 %v573_v56, %v554_v53 }
 0x107   : > { %v620_v58 = vadd.f32 %v610_v54, %v320_v51 }
 0x108   : > { %v621_v59 = vadd.f32 %v574_v57, %v321_v55 }
 0x109   : > { %628 = vst [vmem:[#allocation2] sm:$0xff] %v620_v58 }
 0x10a   : > { %629 = vst [vmem:[#allocation2 + $0x18] sm:$0xff] %v621_v59 }
 0x10b   : > { %v592_v60 = vpop.f32.mrf.mxu2 }
 0x10c   : > { %v611_v62 = vpop.f32.mrf.mxu3  ;;  %v557_v63 = vpop.f32.mrf.mxu0 }
 0x10d   : > { %v612_v0 = vadd.f32 %v611_v62, %v592_v60  ;;  %v576_v2 = vpop.f32.mrf.mxu1 }
 0x10e   : > { %v577_v3 = vadd.f32 %v576_v2, %v557_v63 }
 0x10f   : > { %v622_v4 = vadd.f32 %v612_v0, %v322_v61 }
 0x110   : > { %v623_v5 = vadd.f32 %v577_v3, %v323_v1 }
 0x111   : > { %630 = vst [vmem:[#allocation2 + $0x10] sm:$0xff] %v622_v4 }
 0x112   : > { %631 = vst [vmem:[#allocation2 + $0x8] sm:$0xff] %v623_v5 }
 0x113   : > { %v595_v6 = vpop.f32.mrf.mxu2 }
 0x114   : > { %v614_v8 = vpop.f32.mrf.mxu3  ;;  %v559_v9 = vpop.f32.mrf.mxu0 }
 0x115   : > { %v615_v10 = vadd.f32 %v614_v8, %v595_v6  ;;  %v578_v12 = vpop.f32.mrf.mxu1 }
 0x116   : > { %v579_v13 = vadd.f32 %v578_v12, %v559_v9 }
 0x117   : > { %v624_v14 = vadd.f32 %v615_v10, %v324_v7 }
 0x118   : > { %v625_v15 = vadd.f32 %v579_v13, %v325_v11 }
 0x119   : > { %632 = vst [vmem:[#allocation2 + $0x20] sm:$0xff] %v624_v14 }
 0x11a   : > { %633 = vst [vmem:[#allocation2 + $0x28] sm:$0xff] %v625_v15 }
 0x11b   : > { %v597_v16 = vpop.f32.mrf.mxu2 }
 0x11c   : > { %v616_v18 = vpop.f32.mrf.mxu3 }
 0x11d   : > { %v617_v19 = vadd.f32 %v616_v18, %v597_v16  ;;  %638 = sbr.rel (%p999_p11) target bundleno = 305 (0x131), region = 52 }
 0x11f   : > { %v626_v20 = vadd.f32 %v617_v19, %v326_v17 }
 0x121   : > { %634 = vst [vmem:[#allocation2 + $0x38] sm:$0xff] %v626_v20 }
 0x122   : > { %v639_v21 = vld [vmem:[#allocation2 + $0x30] sm:$0xff]  ;;  %v647_v22 = vld [vmem:[%s1702_s10] sm:$0x3]  ;;  %v641_v26 = vld [vmem:[#allocation2 + $0x18] sm:$0xff] }
 0x123   : > { %v640_v23 = vld [vmem:[#allocation2] sm:$0xff]  ;;  %v649_v24 = vperm.slane %v647_v22, 0  ;;  %v650_v25 = vperm.slane %v647_v22, 1  ;;  %v642_v27 = vld [vmem:[#allocation2 + $0x10] sm:$0xff]  ;;  %v643_v28 = vld [vmem:[#allocation2 + $0x8] sm:$0xff] }
 0x124   : > { %v644_v29 = vld [vmem:[#allocation2 + $0x20] sm:$0xff]  ;;  %v645_v30 = vld [vmem:[#allocation2 + $0x28] sm:$0xff] }
 0x125   : > { %v653_v31 = vadd.f32 %v649_v24, %v639_v21  ;;  %v654_v32 = vadd.f32 %v650_v25, %v640_v23  ;;  %v655_v33 = vadd.f32 %v649_v24, %v641_v26  ;;  %v656_v34 = vadd.f32 %v650_v25, %v642_v27 }
 0x126   : > { %v657_v36 = vadd.f32 %v649_v24, %v643_v28  ;;  %v658_v37 = vadd.f32 %v650_v25, %v644_v29  ;;  %v659_v41 = vadd.f32 %v649_v24, %v645_v30 }
 0x127   : > { %v661_v38 = vmax.f32 %v653_v31, 0.0  ;;  %v662_v39 = vmax.f32 %v654_v32, 0.0  ;;  %v663_v40 = vmax.f32 %v655_v33, 0.0  ;;  %v664_v42 = vmax.f32 %v656_v34, 0.0 }
 0x128   : > { %v646_v35 = vld [vmem:[#allocation2 + $0x38] sm:$0xff]  ;;  %v665_v44 = vmax.f32 %v657_v36, 0.0  ;;  %v666_v45 = vmax.f32 %v658_v37, 0.0  ;;  %v667_v46 = vmax.f32 %v659_v41, 0.0 }
 0x129   : > { %v660_v43 = vadd.f32 %v650_v25, %v646_v35  ;;  %669 = vst [vmem:[%s1709_s9] sm:$0xff] %v661_v38 }
 0x12a   : > { %670 = vst [vmem:[%s1709_s9 + $0x8] sm:$0xff] %v662_v39 }
 0x12b   : > { %671 = vst [vmem:[%s1709_s9 + $0x10] sm:$0xff] %v663_v40  ;;  %v668_v47 = vmax.f32 %v660_v43, 0.0 }
 0x12c   : > { %672 = vst [vmem:[%s1709_s9 + $0x18] sm:$0xff] %v664_v42 }
 0x12d   : > { %673 = vst [vmem:[%s1709_s9 + $0x20] sm:$0xff] %v665_v44 }
 0x12e   : > { %674 = vst [vmem:[%s1709_s9 + $0x28] sm:$0xff] %v666_v45 }
 0x12f   : > { %675 = vst [vmem:[%s1709_s9 + $0x30] sm:$0xff] %v667_v46 }
 0x130   : > { %676 = vst [vmem:[%s1709_s9 + $0x38] sm:$0xff] %v668_v47 }
 0x131 PF: > { %s1043_s17 = sshll.u32 %s1420_s22, 4  ;;  %s1897_s26 = sld [smem:[#allocation24_spill]] }
 0x132   : > { %s693_s30 = sshll.u32 %s1709_s9, 4  ;;  %s678_s18 = scalar_lea.sflag [#allocation5], %s1699_s24  ;;  %s694_s30 = int_to_ptr.vmem [resolvable:$true] %s693_s30 }
 0x137   : > { %s692_s5 = scalar_lea.hbm %s1897_s26, %s1043_s17  ;;  %s1298_s22 = scalar_lea.hbm %s1897_s26, 128 }
 0x138   : > { %s695_s28 = sshll.u32 %s692_s5, 4  ;;  %s696_s28 = int_to_ptr.hbm [resolvable:$true] %s695_s28 }
 0x139   : > { %s1292_s1 = sshra.s32 %s696_s28, 4  ;;  %s1293_s1 = int_to_ptr.hbm [resolvable:$true] %s1292_s1 }
 0x13a   : > { %s1294_s15 = scalar_lea.hbm %s1293_s1, 64  ;;  %p1299_p10 = scmp.lt.s32.totalorder %s1293_s1, %s1897_s26 }
 0x13b   : > { %p1295_p5 = scmp.ne.s32.totalorder %s1293_s1, %s1294_s15  ;;  %p1300_p12 = scmp.lt.s32.totalorder %s1298_s22, %s1294_s15 }
 0x13d   : > { %p1296_p8 = pnand %p1295_p5, %p1663_p1  ;;  %p1301_p13 = por %p1300_p12, %p1299_p10 }
 0x13f   : > { %p1297_p4 = pneg %p1296_p8 }
 0x141   : > { %p1302_p6 = pnand %p1301_p13, %p1297_p4 }
 0x143   : > { %1305 = shalt.err (!%p1302_p6)
}
 0x144   : > { %s1439_s8 = smov 256   ;;  %s1440_s24 = smov 512  }
 0x145   : > { %s1441_s3 = smov 16  }
 0x146   : > { %1050 = dma.vmem_to_hbm [thread:$0]  (%p1663_p1), %s694_s30, 1024, %s696_s28, %s678_s18, %s1439_s8, %s1440_s24, %s1441_s3  }
 0x147 PF: > { %p1067_p0 = scmp.ge.s32.totalorder %s1432_s25, 2  ;;  %s710_s10 = sand.u32 1, %s1380_s12  }
 0x148   : > { %s711_s6 = scalar_lea.sflag [#allocation5], %s710_s10 }
 0x149   : > { %p1063_p2 = pnand %p1067_p0, %p1667_p9 }
 0x14b   : > { %p1064_p3 = pneg %p1063_p2 }
 0x14d   : > { %1375 = dma.done.wait (%p1064_p3), %s711_s6, 1024  }
 0x14e   : > { %1377 = vsyncadd (%p1064_p3), %s711_s6, 4294966272  ;;  %s22_s25 = sadd.s32 1, %s1432_s25   ;;  %s1899_s4 = sld [smem:[#allocation14_spill]] }
 0x14f   : > { %p1815_p7 = scmp.ge.s32.totalorder %s22_s25, 78   ;;  %s1900_s17 = sld [smem:[#allocation21_spill]] }
 0x150   : > { %s1901_s21 = sld [smem:[#allocation15_spill]]  ;;  %s1907_s12 = smov %s1384_s13 }
 0x151   : > { %s1902_s20 = sld [smem:[#allocation19_spill]]  ;;  %s1908_s13 = smov %s1388_s14 }
 0x152   : > { %s1903_s7 = sld [smem:[#allocation16_spill]]  ;;  %s1909_s14 = smov %s1648_s29 }
 0x153   : > { %s1904_s22 = sld [smem:[#allocation17_spill]]  ;;  %s1910_s15 = smov %s1396_s16 }
 0x154   : > { %s1905_s23 = sld [smem:[#allocation18_spill]]  ;;  %s1911_s16 = smov %s1899_s4 }
 0x155   : > { %s1906_s24 = sld [smem:[#allocation20_spill]]  ;;  %s1912_s18 = smov %s1408_s19 }
 0x156   : > { %s1913_s19 = smov %s1901_s21  ;;  %21 = sbr.rel (!%p1815_p7) target bundleno = 16 (0x10), region = 109 }
 0x158   : > { %s1914_s21 = smov %s1903_s7 }
 0x15b   :  { %717 = vsyncpa [#allocation4], 1 }
 0x15c   :  { %719 = vsyncpa [#allocation4 + $0x1], 1 }
 0x15d   :  { %720 = vsyncpa [#allocation7], 1 }
 0x15e   :  { %722 = vsyncpa [#allocation7 + $0x1], 1 }
 0x15f   :  { %723 = vsyncpa [#allocation5], 1 }
 0x160   :  { %725 = vsyncpa [#allocation5 + $0x1], 1 }

</bundles_post_ra>
